<compile_context>
chip_gen: v6e
topology: v6e:2x2x1
jax: 0.10.0
libtpu: 0.0.40
codegen_flags: <defaults>
</compile_context>

<pallas_src>
import functools

import jax
import jax.numpy as jnp
from jax.experimental import pallas as pl
from jax.experimental.pallas import tpu as pltpu


def _attention_kernel(xq_ref, xkv_ref, wq_ref, wkv_ref, wo_ref, bo_ref, o_ref,
                      *, heads, dim_head):
    """One grid step == (one batch element, one tile of query rows)."""
    inner = heads * dim_head

    x_q = xq_ref[0]    # (tq, dim)  query rows for this step
    x_kv = xkv_ref[0]  # (n,  dim)  full sequence for K / V

    # Fused, lane-dense projections (softmax scale already folded into wq in wrapper).
    q_all = jnp.dot(x_q, wq_ref[...], preferred_element_type=jnp.float32)     # (tq, inner)
    kv_all = jnp.dot(x_kv, wkv_ref[...], preferred_element_type=jnp.float32)  # (n, 2*inner)
    k_all = kv_all[:, :inner]
    v_all = kv_all[:, inner:]

    wo_t = wo_ref[...]                       # (inner, dim) -- small, load once
    tq = x_q.shape[0]
    dim = wo_t.shape[1]

    y = jnp.zeros((tq, dim), dtype=jnp.float32)
    for h in range(heads):                   # heads is small & static -> unrolled
        lo, hi = h * dim_head, (h + 1) * dim_head
        q_h = q_all[:, lo:hi]                # static lane slices of the fused results
        k_h = k_all[:, lo:hi]
        v_h = v_all[:, lo:hi]

        # dots = (q * scale) @ k^T  (scale already inside q via the weight fold)
        dots = jnp.einsum('ne,me->nm', q_h, k_h,
                          preferred_element_type=jnp.float32)                 # (tq, n)

        # numerically-stabilized softmax over the last axis (matches nn.Softmax)
        dots = dots - jnp.max(dots, axis=-1, keepdims=True)
        p = jnp.exp(dots)
        attn = p * pl.reciprocal(jnp.sum(p, axis=-1, keepdims=True), approx=True)

        o_h = jnp.dot(attn, v_h, preferred_element_type=jnp.float32)          # (tq, dim_head)
        # Accumulate output projection per head -> no lane-axis concat needed.
        y = y + jnp.dot(o_h, wo_t[lo:hi, :], preferred_element_type=jnp.float32)

    # to_out: Linear bias add.  Dropout(p=0.0) is identity.
    o_ref[0] = (y + bo_ref[...]).astype(o_ref.dtype)


def attention_pallas(x, wq, wk, wv, wo, bo, *, heads, dim_head):
    """x: (b, n, dim).  wq/wk: (heads, dim_head, dim), wv: (inner, dim),
    wo: (dim, inner), bo: (dim,) -- PyTorch nn.Linear weight conventions."""
    b, n, dim = x.shape
    inner = heads * dim_head
    scale = dim_head ** -0.5

    # Glue: stack per-head weights head-major into wide matmul operands and
    # fold the softmax scale into Wq.
    wq_all = jnp.transpose(wq, (2, 0, 1)).reshape(dim, inner) * scale  # (dim, inner)
    wk_all = jnp.transpose(wk, (2, 0, 1)).reshape(dim, inner)          # (dim, inner)
    wv_t = wv.T                                                        # (dim, inner)
    wkv = jnp.concatenate([wk_all, wv_t], axis=1)                      # (dim, 2*inner)
    wo_t = wo.T                                                        # (inner, dim)
    bo2 = bo.reshape(1, dim)

    # q-row tiling: 128-row tiles when the sequence divides evenly, else full seq.
    tq = 128 if (n % 128 == 0) else n
    grid = (b, n // tq)

    kernel = functools.partial(_attention_kernel, heads=heads, dim_head=dim_head)

    return pl.pallas_call(
        kernel,
        out_shape=jax.ShapeDtypeStruct((b, n, dim), x.dtype),
        grid_spec=pltpu.PrefetchScalarGridSpec(
            num_scalar_prefetch=0,
            grid=grid,
            in_specs=[
                pl.BlockSpec((1, tq, dim), lambda i, j: (i, j, 0)),   # x: query rows
                pl.BlockSpec((1, n, dim), lambda i, j: (i, 0, 0)),    # x: full seq for K/V
                pl.BlockSpec((dim, inner), lambda i, j: (0, 0)),      # Wq_all (scaled)
                pl.BlockSpec((dim, 2 * inner), lambda i, j: (0, 0)),  # [Wk_all | Wv_all]
                pl.BlockSpec((inner, dim), lambda i, j: (0, 0)),      # Wo.T
                pl.BlockSpec((1, dim), lambda i, j: (0, 0)),          # bias
            ],
            out_specs=pl.BlockSpec((1, tq, dim), lambda i, j: (i, j, 0)),
        ),
        compiler_params=pltpu.CompilerParams(
            dimension_semantics=("parallel", "parallel")),
    )(x, x, wq_all, wkv, wo_t, bo2)


def attention_reference(x, wq, wk, wv, wo, bo, *, heads, dim_head):
    """Pure-JAX reference mirroring the PyTorch forward exactly."""
    b, n, dim = x.shape
    scale = dim_head ** -0.5
    q = jnp.einsum('bnd,hed->bhne', x, wq)                    # (b, heads, n, dim_head)
    k = jnp.einsum('bnd,hed->bhne', x, wk)
    v = jnp.einsum('bnd,ed->bne', x, wv)                      # (b, n, inner)
    v = v.reshape(b, n, heads, dim_head).transpose(0, 2, 1, 3)
    dots = jnp.einsum('bhne,bhme->bhnm', q, k) * scale
    attn = jax.nn.softmax(dots, axis=-1)
    out = jnp.einsum('bhnm,bhme->bhne', attn, v)
    out = out.transpose(0, 2, 1, 3).reshape(b, n, heads * dim_head)
    return jnp.einsum('bni,di->bnd', out, wo) + bo


if __name__ == "__main__":
    # Small shapes consistent with the module's forward.
    batch, seq, dim = 2, 8, 32
    heads, dim_head = 4, 16
    inner_dim = heads * dim_head

    key = jax.random.PRNGKey(0)
    kx, kq, kk, kv, ko, kb = jax.random.split(key, 6)

    x = jax.random.normal(kx, (batch, seq, dim), dtype=jnp.float32)
    # PyTorch nn.Linear(in, out) weight shape is (out, in).
    wq = jax.random.normal(kq, (heads, dim_head, dim), dtype=jnp.float32) * 0.05
    wk = jax.random.normal(kk, (heads, dim_head, dim), dtype=jnp.float32) * 0.05
    wv = jax.random.normal(kv, (inner_dim, dim), dtype=jnp.float32) * 0.05
    wo = jax.random.normal(ko, (dim, inner_dim), dtype=jnp.float32) * 0.05
    bo = jax.random.normal(kb, (dim,), dtype=jnp.float32) * 0.05

    out = attention_pallas(x, wq, wk, wv, wo, bo, heads=heads, dim_head=dim_head)
    out = jax.block_until_ready(out)

    ref = attention_reference(x, wq, wk, wv, wo, bo, heads=heads, dim_head=dim_head)
    assert out.shape == (batch, seq, dim)
    # Tolerance accounts for the approx-reciprocal softmax normalization (EUP path).
    assert jnp.allclose(out, ref, atol=2e-3, rtol=2e-3), "mismatch vs reference"

    print("KERNEL_OK")
</pallas_src>

<mosaic_0001>
module attributes {stable_mosaic.version = 11 : i64} {
  func.func @_attention_kernel(%arg0: i32, %arg1: i32, %arg2: memref<1x8x32xf32, #tpu.memory_space<vmem>>, %arg3: memref<1x8x32xf32, #tpu.memory_space<vmem>>, %arg4: memref<32x64xf32, #tpu.memory_space<vmem>>, %arg5: memref<32x128xf32, #tpu.memory_space<vmem>>, %arg6: memref<64x32xf32, #tpu.memory_space<vmem>>, %arg7: memref<1x32xf32, #tpu.memory_space<vmem>>, %arg8: memref<1x8x32xf32, #tpu.memory_space<vmem>>) attributes {dimension_semantics = [#tpu.dimension_semantics<parallel>, #tpu.dimension_semantics<parallel>], iteration_bounds = array<i64: 2, 1>, scalar_prefetch = 0 : i64, scratch_operands = 0 : i64, tpu.core_type = #tpu.core_type<tc>, window_params = [{transform_indices = @transform_0, window_bounds = array<i64: 1, 8, 32>}, {transform_indices = @transform_1, window_bounds = array<i64: 1, 8, 32>}, {pipeline_mode = #tpu.pipeline_mode<synchronous>, transform_indices = @transform_2, window_bounds = array<i64: 32, 64>}, {pipeline_mode = #tpu.pipeline_mode<synchronous>, transform_indices = @transform_3, window_bounds = array<i64: 32, 128>}, {pipeline_mode = #tpu.pipeline_mode<synchronous>, transform_indices = @transform_4, window_bounds = array<i64: 64, 32>}, {pipeline_mode = #tpu.pipeline_mode<synchronous>, transform_indices = @transform_5, window_bounds = array<i64: 1, 32>}, {transform_indices = @transform_6, window_bounds = array<i64: 1, 8, 32>}]} {
    %c0 = arith.constant 0 : index
    %c0_0 = arith.constant 0 : index
    %c0_1 = arith.constant 0 : index
    %0 = vector.load %arg2[%c0, %c0_0, %c0_1] : memref<1x8x32xf32, #tpu.memory_space<vmem>>, vector<1x8x32xf32>
    %1 = vector.shape_cast %0 : vector<1x8x32xf32> to vector<8x32xf32>
    %c0_2 = arith.constant 0 : index
    %c0_3 = arith.constant 0 : index
    %c0_4 = arith.constant 0 : index
    %2 = vector.load %arg3[%c0_2, %c0_3, %c0_4] : memref<1x8x32xf32, #tpu.memory_space<vmem>>, vector<1x8x32xf32>
    %3 = vector.shape_cast %2 : vector<1x8x32xf32> to vector<8x32xf32>
    %c0_5 = arith.constant 0 : index
    %c0_6 = arith.constant 0 : index
    %4 = vector.load %arg4[%c0_5, %c0_6] : memref<32x64xf32, #tpu.memory_space<vmem>>, vector<32x64xf32>
    %cst = arith.constant dense<0.000000e+00> : vector<8x64xf32>
    %5 = tpu.matmul %1, %4, %cst {dimension_numbers = #tpu.dot_dimension_numbers<[1], [0], [0], [1], [0, 0, 1, 1], [], []>} : vector<8x32xf32>, vector<32x64xf32>, vector<8x64xf32> -> vector<8x64xf32>
    %c0_7 = arith.constant 0 : index
    %c0_8 = arith.constant 0 : index
    %6 = vector.load %arg5[%c0_7, %c0_8] : memref<32x128xf32, #tpu.memory_space<vmem>>, vector<32x128xf32>
    %cst_9 = arith.constant dense<0.000000e+00> : vector<8x128xf32>
    %7 = tpu.matmul %3, %6, %cst_9 {dimension_numbers = #tpu.dot_dimension_numbers<[1], [0], [0], [1], [0, 0, 1, 1], [], []>} : vector<8x32xf32>, vector<32x128xf32>, vector<8x128xf32> -> vector<8x128xf32>
    %8 = vector.extract_strided_slice %7 {offsets = [0, 0], sizes = [8, 64], strides = [1, 1]} : vector<8x128xf32> to vector<8x64xf32>
    %9 = vector.extract_strided_slice %7 {offsets = [0, 64], sizes = [8, 64], strides = [1, 1]} : vector<8x128xf32> to vector<8x64xf32>
    %c0_10 = arith.constant 0 : index
    %c0_11 = arith.constant 0 : index
    %10 = vector.load %arg6[%c0_10, %c0_11] : memref<64x32xf32, #tpu.memory_space<vmem>>, vector<64x32xf32>
    %cst_12 = arith.constant 0.000000e+00 : f32
    %11 = vector.broadcast %cst_12 : f32 to vector<8x32xf32>
    %12 = vector.extract_strided_slice %5 {offsets = [0, 0], sizes = [8, 16], strides = [1, 1]} : vector<8x64xf32> to vector<8x16xf32>
    %13 = vector.extract_strided_slice %8 {offsets = [0, 0], sizes = [8, 16], strides = [1, 1]} : vector<8x64xf32> to vector<8x16xf32>
    %14 = vector.extract_strided_slice %9 {offsets = [0, 0], sizes = [8, 16], strides = [1, 1]} : vector<8x64xf32> to vector<8x16xf32>
    "tpu.trace_start"() <{level = 10 : i32, message = "ne,me->nm"}> : () -> ()
    %cst_13 = arith.constant dense<0.000000e+00> : vector<8x8xf32>
    %15 = tpu.matmul %12, %13, %cst_13 {dimension_numbers = #tpu.dot_dimension_numbers<[1], [1], [0], [0], [0, 0, 1, 0], [], []>} : vector<8x16xf32>, vector<8x16xf32>, vector<8x8xf32> -> vector<8x8xf32>
    "tpu.trace_stop"() : () -> ()
    %cst_14 = arith.constant dense<0xFF800000> : vector<8xf32>
    %16 = vector.multi_reduction <maximumf>, %15, %cst_14 [1] : vector<8x8xf32> to vector<8xf32>
    %17 = vector.shape_cast %16 : vector<8xf32> to vector<8x1xf32>
    %18 = vector.broadcast %17 : vector<8x1xf32> to vector<8x8xf32>
    %19 = arith.subf %15, %18 : vector<8x8xf32>
    %20 = math.exp %19 : vector<8x8xf32>
    %cst_15 = arith.constant dense<0.000000e+00> : vector<8xf32>
    %21 = vector.multi_reduction <add>, %20, %cst_15 [1] : vector<8x8xf32> to vector<8xf32>
    %22 = vector.shape_cast %21 : vector<8xf32> to vector<8x1xf32>
    %23 = tpu.reciprocal %22 {approx = true} : vector<8x1xf32> -> vector<8x1xf32>
    %24 = vector.broadcast %23 : vector<8x1xf32> to vector<8x8xf32>
    %25 = arith.mulf %20, %24 : vector<8x8xf32>
    %cst_16 = arith.constant dense<0.000000e+00> : vector<8x16xf32>
    %26 = tpu.matmul %25, %14, %cst_16 {dimension_numbers = #tpu.dot_dimension_numbers<[1], [0], [0], [1], [0, 0, 1, 1], [], []>} : vector<8x8xf32>, vector<8x16xf32>, vector<8x16xf32> -> vector<8x16xf32>
    %27 = vector.extract_strided_slice %10 {offsets = [0, 0], sizes = [16, 32], strides = [1, 1]} : vector<64x32xf32> to vector<16x32xf32>
    %cst_17 = arith.constant dense<0.000000e+00> : vector<8x32xf32>
    %28 = tpu.matmul %26, %27, %cst_17 {dimension_numbers = #tpu.dot_dimension_numbers<[1], [0], [0], [1], [0, 0, 1, 1], [], []>} : vector<8x16xf32>, vector<16x32xf32>, vector<8x32xf32> -> vector<8x32xf32>
    %29 = arith.addf %11, %28 : vector<8x32xf32>
    %30 = vector.extract_strided_slice %5 {offsets = [0, 16], sizes = [8, 16], strides = [1, 1]} : vector<8x64xf32> to vector<8x16xf32>
    %31 = vector.extract_strided_slice %8 {offsets = [0, 16], sizes = [8, 16], strides = [1, 1]} : vector<8x64xf32> to vector<8x16xf32>
    %32 = vector.extract_strided_slice %9 {offsets = [0, 16], sizes = [8, 16], strides = [1, 1]} : vector<8x64xf32> to vector<8x16xf32>
    "tpu.trace_start"() <{level = 10 : i32, message = "ne,me->nm"}> : () -> ()
    %cst_18 = arith.constant dense<0.000000e+00> : vector<8x8xf32>
    %33 = tpu.matmul %30, %31, %cst_18 {dimension_numbers = #tpu.dot_dimension_numbers<[1], [1], [0], [0], [0, 0, 1, 0], [], []>} : vector<8x16xf32>, vector<8x16xf32>, vector<8x8xf32> -> vector<8x8xf32>
    "tpu.trace_stop"() : () -> ()
    %cst_19 = arith.constant dense<0xFF800000> : vector<8xf32>
    %34 = vector.multi_reduction <maximumf>, %33, %cst_19 [1] : vector<8x8xf32> to vector<8xf32>
    %35 = vector.shape_cast %34 : vector<8xf32> to vector<8x1xf32>
    %36 = vector.broadcast %35 : vector<8x1xf32> to vector<8x8xf32>
    %37 = arith.subf %33, %36 : vector<8x8xf32>
    %38 = math.exp %37 : vector<8x8xf32>
    %cst_20 = arith.constant dense<0.000000e+00> : vector<8xf32>
    %39 = vector.multi_reduction <add>, %38, %cst_20 [1] : vector<8x8xf32> to vector<8xf32>
    %40 = vector.shape_cast %39 : vector<8xf32> to vector<8x1xf32>
    %41 = tpu.reciprocal %40 {approx = true} : vector<8x1xf32> -> vector<8x1xf32>
    %42 = vector.broadcast %41 : vector<8x1xf32> to vector<8x8xf32>
    %43 = arith.mulf %38, %42 : vector<8x8xf32>
    %cst_21 = arith.constant dense<0.000000e+00> : vector<8x16xf32>
    %44 = tpu.matmul %43, %32, %cst_21 {dimension_numbers = #tpu.dot_dimension_numbers<[1], [0], [0], [1], [0, 0, 1, 1], [], []>} : vector<8x8xf32>, vector<8x16xf32>, vector<8x16xf32> -> vector<8x16xf32>
    %45 = vector.extract_strided_slice %10 {offsets = [16, 0], sizes = [16, 32], strides = [1, 1]} : vector<64x32xf32> to vector<16x32xf32>
    %cst_22 = arith.constant dense<0.000000e+00> : vector<8x32xf32>
    %46 = tpu.matmul %44, %45, %cst_22 {dimension_numbers = #tpu.dot_dimension_numbers<[1], [0], [0], [1], [0, 0, 1, 1], [], []>} : vector<8x16xf32>, vector<16x32xf32>, vector<8x32xf32> -> vector<8x32xf32>
    %47 = arith.addf %29, %46 : vector<8x32xf32>
    %48 = vector.extract_strided_slice %5 {offsets = [0, 32], sizes = [8, 16], strides = [1, 1]} : vector<8x64xf32> to vector<8x16xf32>
    %49 = vector.extract_strided_slice %8 {offsets = [0, 32], sizes = [8, 16], strides = [1, 1]} : vector<8x64xf32> to vector<8x16xf32>
    %50 = vector.extract_strided_slice %9 {offsets = [0, 32], sizes = [8, 16], strides = [1, 1]} : vector<8x64xf32> to vector<8x16xf32>
    "tpu.trace_start"() <{level = 10 : i32, message = "ne,me->nm"}> : () -> ()
    %cst_23 = arith.constant dense<0.000000e+00> : vector<8x8xf32>
    %51 = tpu.matmul %48, %49, %cst_23 {dimension_numbers = #tpu.dot_dimension_numbers<[1], [1], [0], [0], [0, 0, 1, 0], [], []>} : vector<8x16xf32>, vector<8x16xf32>, vector<8x8xf32> -> vector<8x8xf32>
    "tpu.trace_stop"() : () -> ()
    %cst_24 = arith.constant dense<0xFF800000> : vector<8xf32>
    %52 = vector.multi_reduction <maximumf>, %51, %cst_24 [1] : vector<8x8xf32> to vector<8xf32>
    %53 = vector.shape_cast %52 : vector<8xf32> to vector<8x1xf32>
    %54 = vector.broadcast %53 : vector<8x1xf32> to vector<8x8xf32>
    %55 = arith.subf %51, %54 : vector<8x8xf32>
    %56 = math.exp %55 : vector<8x8xf32>
    %cst_25 = arith.constant dense<0.000000e+00> : vector<8xf32>
    %57 = vector.multi_reduction <add>, %56, %cst_25 [1] : vector<8x8xf32> to vector<8xf32>
    %58 = vector.shape_cast %57 : vector<8xf32> to vector<8x1xf32>
    %59 = tpu.reciprocal %58 {approx = true} : vector<8x1xf32> -> vector<8x1xf32>
    %60 = vector.broadcast %59 : vector<8x1xf32> to vector<8x8xf32>
    %61 = arith.mulf %56, %60 : vector<8x8xf32>
    %cst_26 = arith.constant dense<0.000000e+00> : vector<8x16xf32>
    %62 = tpu.matmul %61, %50, %cst_26 {dimension_numbers = #tpu.dot_dimension_numbers<[1], [0], [0], [1], [0, 0, 1, 1], [], []>} : vector<8x8xf32>, vector<8x16xf32>, vector<8x16xf32> -> vector<8x16xf32>
    %63 = vector.extract_strided_slice %10 {offsets = [32, 0], sizes = [16, 32], strides = [1, 1]} : vector<64x32xf32> to vector<16x32xf32>
    %cst_27 = arith.constant dense<0.000000e+00> : vector<8x32xf32>
    %64 = tpu.matmul %62, %63, %cst_27 {dimension_numbers = #tpu.dot_dimension_numbers<[1], [0], [0], [1], [0, 0, 1, 1], [], []>} : vector<8x16xf32>, vector<16x32xf32>, vector<8x32xf32> -> vector<8x32xf32>
    %65 = arith.addf %47, %64 : vector<8x32xf32>
    %66 = vector.extract_strided_slice %5 {offsets = [0, 48], sizes = [8, 16], strides = [1, 1]} : vector<8x64xf32> to vector<8x16xf32>
    %67 = vector.extract_strided_slice %8 {offsets = [0, 48], sizes = [8, 16], strides = [1, 1]} : vector<8x64xf32> to vector<8x16xf32>
    %68 = vector.extract_strided_slice %9 {offsets = [0, 48], sizes = [8, 16], strides = [1, 1]} : vector<8x64xf32> to vector<8x16xf32>
    "tpu.trace_start"() <{level = 10 : i32, message = "ne,me->nm"}> : () -> ()
    %cst_28 = arith.constant dense<0.000000e+00> : vector<8x8xf32>
    %69 = tpu.matmul %66, %67, %cst_28 {dimension_numbers = #tpu.dot_dimension_numbers<[1], [1], [0], [0], [0, 0, 1, 0], [], []>} : vector<8x16xf32>, vector<8x16xf32>, vector<8x8xf32> -> vector<8x8xf32>
    "tpu.trace_stop"() : () -> ()
    %cst_29 = arith.constant dense<0xFF800000> : vector<8xf32>
    %70 = vector.multi_reduction <maximumf>, %69, %cst_29 [1] : vector<8x8xf32> to vector<8xf32>
    %71 = vector.shape_cast %70 : vector<8xf32> to vector<8x1xf32>
    %72 = vector.broadcast %71 : vector<8x1xf32> to vector<8x8xf32>
    %73 = arith.subf %69, %72 : vector<8x8xf32>
    %74 = math.exp %73 : vector<8x8xf32>
    %cst_30 = arith.constant dense<0.000000e+00> : vector<8xf32>
    %75 = vector.multi_reduction <add>, %74, %cst_30 [1] : vector<8x8xf32> to vector<8xf32>
    %76 = vector.shape_cast %75 : vector<8xf32> to vector<8x1xf32>
    %77 = tpu.reciprocal %76 {approx = true} : vector<8x1xf32> -> vector<8x1xf32>
    %78 = vector.broadcast %77 : vector<8x1xf32> to vector<8x8xf32>
    %79 = arith.mulf %74, %78 : vector<8x8xf32>
    %cst_31 = arith.constant dense<0.000000e+00> : vector<8x16xf32>
    %80 = tpu.matmul %79, %68, %cst_31 {dimension_numbers = #tpu.dot_dimension_numbers<[1], [0], [0], [1], [0, 0, 1, 1], [], []>} : vector<8x8xf32>, vector<8x16xf32>, vector<8x16xf32> -> vector<8x16xf32>
    %81 = vector.extract_strided_slice %10 {offsets = [48, 0], sizes = [16, 32], strides = [1, 1]} : vector<64x32xf32> to vector<16x32xf32>
    %cst_32 = arith.constant dense<0.000000e+00> : vector<8x32xf32>
    %82 = tpu.matmul %80, %81, %cst_32 {dimension_numbers = #tpu.dot_dimension_numbers<[1], [0], [0], [1], [0, 0, 1, 1], [], []>} : vector<8x16xf32>, vector<16x32xf32>, vector<8x32xf32> -> vector<8x32xf32>
    %83 = arith.addf %65, %82 : vector<8x32xf32>
    %c0_33 = arith.constant 0 : index
    %c0_34 = arith.constant 0 : index
    %84 = vector.load %arg7[%c0_33, %c0_34] : memref<1x32xf32, #tpu.memory_space<vmem>>, vector<1x32xf32>
    %85 = vector.broadcast %84 : vector<1x32xf32> to vector<8x32xf32>
    %86 = arith.addf %83, %85 : vector<8x32xf32>
    %c0_35 = arith.constant 0 : index
    %c0_36 = arith.constant 0 : index
    %c0_37 = arith.constant 0 : index
    %87 = vector.load %arg8[%c0_35, %c0_36, %c0_37] : memref<1x8x32xf32, #tpu.memory_space<vmem>>, vector<1x8x32xf32>
    %88 = vector.shape_cast %87 : vector<1x8x32xf32> to vector<8x32xf32>
    %89 = vector.shape_cast %86 : vector<8x32xf32> to vector<1x8x32xf32>
    tpu.vector_store %arg8[%c0_35, %c0_36, %c0_37], %89 {strides = array<i32>} : memref<1x8x32xf32, #tpu.memory_space<vmem>>, vector<1x8x32xf32>,
    return
  }
  func.func @transform_0(%arg0: i32, %arg1: i32) -> (i32, i32, i32) {
    %c0_i32 = arith.constant 0 : i32
    %c0_i32_0 = arith.constant 0 : i32
    return %arg0, %arg1, %c0_i32 : i32, i32, i32
  }
  func.func @transform_1(%arg0: i32, %arg1: i32) -> (i32, i32, i32) {
    %c0_i32 = arith.constant 0 : i32
    %c0_i32_0 = arith.constant 0 : i32
    %c0_i32_1 = arith.constant 0 : i32
    return %arg0, %c0_i32, %c0_i32_0 : i32, i32, i32
  }
  func.func @transform_2(%arg0: i32, %arg1: i32) -> (i32, i32) {
    %c0_i32 = arith.constant 0 : i32
    %c0_i32_0 = arith.constant 0 : i32
    %c0_i32_1 = arith.constant 0 : i32
    return %c0_i32, %c0_i32_0 : i32, i32
  }
  func.func @transform_3(%arg0: i32, %arg1: i32) -> (i32, i32) {
    %c0_i32 = arith.constant 0 : i32
    %c0_i32_0 = arith.constant 0 : i32
    %c0_i32_1 = arith.constant 0 : i32
    return %c0_i32, %c0_i32_0 : i32, i32
  }
  func.func @transform_4(%arg0: i32, %arg1: i32) -> (i32, i32) {
    %c0_i32 = arith.constant 0 : i32
    %c0_i32_0 = arith.constant 0 : i32
    %c0_i32_1 = arith.constant 0 : i32
    return %c0_i32, %c0_i32_0 : i32, i32
  }
  func.func @transform_5(%arg0: i32, %arg1: i32) -> (i32, i32) {
    %c0_i32 = arith.constant 0 : i32
    %c0_i32_0 = arith.constant 0 : i32
    %c0_i32_1 = arith.constant 0 : i32
    return %c0_i32, %c0_i32_0 : i32, i32
  }
  func.func @transform_6(%arg0: i32, %arg1: i32) -> (i32, i32, i32) {
    %c0_i32 = arith.constant 0 : i32
    %c0_i32_0 = arith.constant 0 : i32
    return %arg0, %arg1, %c0_i32 : i32, i32, i32
  }
}

</mosaic_0001>

<bundles_post_ra>
// kernel: tpu_custom_call.1
= control target key start
LH: loop header
LB: loop body
LE: loop exit
PB: predicated region body
PF: predicated region fallthrough
CT: control target
= control target key end

     0   :  { %11 = vsyncpa [#allocation3], 0  ;;  %s2125_s0 = inlined_call_operand.vmem [shape: f32[2,8,32], index: 0, kind: input, shape index: {}]   ;;  %s2126_s1 = inlined_call_operand.vmem [shape: f32[2,8,32], index: 1, kind: input, shape index: {}]   ;;  %s2127_s2 = inlined_call_operand.vmem [shape: f32[32,64], index: 2, kind: input, shape index: {}]   ;;  %s2128_s3 = inlined_call_operand.vmem [shape: f32[32,128], index: 3, kind: input, shape index: {}]   ;;  %s2129_s4 = inlined_call_operand.vmem [shape: f32[64,32], index: 4, kind: input, shape index: {}]   ;;  %s2130_s5 = inlined_call_operand.vmem [shape: f32[1,32], index: 5, kind: input, shape index: {}]   ;;  %s2131_s6 = inlined_call_operand.hbm [shape: f32[2,8,32], index: 6, kind: output, shape index: {}]  }
   0x1   :  { %13 = vsyncpa [#allocation3 + $0x1], 0  ;;  %s1877_s21 = smov 0   ;;  %s1879_s22 = smov 0  }
   0x2   :  { %s1881_s23 = smov 0   ;;  %s1883_s24 = smov 0  }
   0x3   :  { %s1885_s25 = smov 0   ;;  %s1887_s26 = smov 0  }
   0x4 LB: > { %s1515_s27 = sadd.s32 4294967295, %s1830_s26   ;;  %s1516_s28 = sadd.s32 4294967294, %s1830_s26   ;;  %s1830_s26 = sphi %s1887_s26, %s19_s26   ;;  %s1826_s25 = sphi %s1885_s25, %s2138_s25   ;;  %s1822_s24 = sphi %s1883_s24, %s2137_s24   ;;  %s1818_s23 = sphi %s1881_s23, %s2136_s23   ;;  %s1814_s22 = sphi %s1879_s22, %s2135_s22   ;;  %s1810_s21 = sphi %s1877_s21, %s2134_s21  }
   0x5   : > { %s31_s29 = sadd.s32 1, %s1826_s25  ;;  %s178_s30 = sadd.s32 1, %s1818_s23 }
   0x6   : > { %p33_p0 = scmp.ge.s32.totalorder %s31_s29, 2  ;;  %p188_p1 = scmp.ne.s32.totalorder %s1818_s23, %s1814_s22 }
   0x7   : > { %p189_p2 = scmp.eq.s32.totalorder %s1515_s27, 1  ;;  %p194_p3 = scmp.ne.s32.totalorder %s1814_s22, %s1810_s21 }
   0x8   : > { %s2140_s29 = smov (%p33_p0, %s31_s29), 0  ;;  %p195_p5 = scmp.eq.s32.totalorder %s1516_s28, 1 }
   0x9   : > { %p1917_p4 = por %p189_p2, %p188_p1  ;;  %s173_s8 = ssub.s32 %s1826_s25, %s2140_s29 }
   0xa   : > { %p1519_p6 = scmp.ge.s32.totalorder %s1830_s26, 1  ;;  %p176_p7 = scmp.eq.s32.totalorder %s173_s8, 0 }
   0xb   : > { %p1924_p8 = por %p195_p5, %p194_p3  ;;  %p242_p9 = scmp.lt.s32.totalorder %s1830_s26, 3 }
   0xc   : > { %s1930_s10 = scalar_select %p176_p7, %s1818_s23, %s178_s30  }
   0xd   : > { %p243_p10 = pnand %p1519_p6, %p242_p9 }
   0xe   : > { %p278_p11 = scmp.lt.s32.totalorder (!%p243_p10), %s1822_s24, 1  ;;  %s1834_s27 = smov (!%p243_p10), 112  }
   0xf   : > { %246 = sbr.rel (%p243_p10) target bundleno = 2460 (0x99c), region = 44  ;;  %s1835_s28 = smov (!%p243_p10), 64  }
  0x10   : > { %s1836_s30 = smov (!%p243_p10), 48   ;;  %s1839_s20 = smov (!%p243_p10), 80  }
  0x11   : > { %s1840_s11 = smov (!%p243_p10), 16   ;;  %s275_s16 = sand.u32 (!%p243_p10), 1, %s1814_s22  }
  0x12   : > { %s1520_s17 = sshll.u32 (!%p243_p10), %s275_s16, 3  ;;  %s1418_s12 = scalar_lea.sflag (!%p243_p10), [#allocation3], %s275_s16 }
  0x13   : > { %s1841_s14 = smov (!%p243_p10), [#allocation2]  }
  0x14   : > { %v372_v0 = vld [vmem:[%s2128_s3 + $0x18] sm:$0xff]  ;;  %v1832_v2 = vmov 0.0   ;;  %v371_v3 = vld [vmem:[%s2128_s3 + $0x10] sm:$0xff]  ;;  %s279_s19 = scalar_select %p278_p11, %s1822_s24, 1  ;;  %v370_v5 = vld [vmem:[%s2128_s3 + $0x8] sm:$0xff]  ;;  %vm295_vm0 = vcmask 261120  }
  0x15   : > { %v294_v1 = vld [vmem:[%s2127_s2 + $0x18] sm:$0xff]  ;;  %1595 = vmatprep.subr.mxu1 %v1832_v2  ;;  %1584 = vmatprep.subr.mxu0 %v1832_v2  ;;  %v293_v4 = vld [vmem:[%s2127_s2 + $0x10] sm:$0xff]  ;;  %v292_v6 = vld [vmem:[%s2127_s2 + $0x8] sm:$0xff]  ;;  %vm1833_vm1 = vmmov 0   ;;  %vm454_vm2 = vcmask 130048   ;;  %vm531_vm3 = vcmask 64512  }
  0x16   : > { %1596 = vmatpush3.msra.mxu1 %v372_v0  ;;  %1585 = vmatpush3.msra.mxu0 %v294_v1  ;;  %s1521_s8 = sshll.u32 %s279_s19, 3  ;;  %v369_v7 = vld [vmem:[%s2128_s3] sm:$0xff]  ;;  %v449_v37 = vld [vmem:[%s2129_s4 + $0x18] sm:$0xff]  ;;  %v448_v38 = vld [vmem:[%s2129_s4 + $0x10] sm:$0xff]  ;;  %s1838_s19 = smov 32  }
  0x17   : > { %1597 = vmatprep.subr.mxu1 %v1832_v2  ;;  %1586 = vmatprep.subr.mxu0 %v1832_v2  ;;  %s288_s15 = scalar_lea.vmem %s2126_s1, %s1521_s8  ;;  %s284_s18 = scalar_lea.vmem %s2125_s0, %s1521_s8  ;;  %v291_v9 = vld [vmem:[%s2127_s2] sm:$0xff]  ;;  %v447_v43 = vld [vmem:[%s2129_s4 + $0x8] sm:$0xff] }
  0x18   : > { %1598 = vmatpush3.msra.mxu1 %v371_v3  ;;  %1587 = vmatpush3.msra.mxu0 %v293_v4  ;;  %v290_v8 = vld [vmem:[%s288_s15] sm:$0xff]  ;;  %s1837_s8 = smov 96   ;;  %v451_v0 = vld [vmem:[%s2129_s4 + $0x28] sm:$0xff] }
  0x19   : > { %1599 = vmatprep.subr.mxu1 %v1832_v2  ;;  %1588 = vmatprep.subr.mxu0 %v1832_v2  ;;  %v289_v10 = vld [vmem:[%s284_s18] sm:$0xff] }
  0x1a   : > { %1600 = vmatpush3.msra.mxu1 %v370_v5  ;;  %1589 = vmatpush3.msra.mxu0 %v292_v6  ;;  %v446_v44 = vld [vmem:[%s2129_s4] sm:$0xff] }
  0x1b   : > { %1601 = vmatprep.subr.mxu1 %v1832_v2  ;;  %1603 = vmatprep.mubr.msk.f32.mxu1 %vm1833_vm1, %v1832_v2 }
  0x1c   : > { %1602 = vmatpush3.msra.mxu1 %v369_v7  ;;  %1590 = vmatprep.subr.mxu0 %v1832_v2  ;;  %v450_v7 = vld [vmem:[%s2129_s4 + $0x20] sm:$0xff] }
  0x1d   : > { %1604 = vmatmul.mubr.msk.f32.vlgmr.msra.gmra.mxu1 %vm295_vm0, %v290_v8  ;;  %1591 = vmatpush3.msra.mxu0 %v291_v9 }
  0x1e   : > { %1592 = vmatprep.mubr.msk.f32.mxu0 %vm1833_vm1, %v1832_v2  ;;  %1606 = vmatprep.subr.mxu0 %v1832_v2 }
  0x1f   : > { %1593 = vmatmul.mubr.msk.f32.vlgmr.msra.gmra.mxu0 %vm295_vm0, %v289_v10  ;;  %1611 = vmatprep.subr.mxu1 %v1832_v2 }
  0x20   : > { %1608 = vmatprep.mubr.msk.f32.mxu0 %vm1833_vm1, %v1832_v2  ;;  %1613 = vmatprep.mubr.msk.f32.mxu1 %vm1833_vm1, %v1832_v2 }
  0xdd   : > { %v1984_v11 = vpop.f32.mrf.mxu1 }
  0xde   : > { %621 = vrot.lane.b32.xlu0 %v1984_v11, %s1834_s27  ;;  %1607 = vmatpush3.xpose.msk.msra.mxu0 %vm454_vm2, %v1984_v11 }
  0xdf   : > { %v1989_v12 = vpop.f32.mrf.mxu0  ;;  %v1605_v13 = vpop.f32.mrf.mxu1  ;;  %1616 = vmatprep.subr.mxu0 %v1832_v2 }
  0xe1   : > { %v1594_v14 = vpop.f32.mrf.mxu0  ;;  %1609 = vmatmul.mubr.msk.f32.vlgmr.msra.gmra.mxu0 %vm454_vm2, %v1989_v12 }
  0xe2   : > { %619 = vrot.lane.b32.xlu0 %v1989_v12, %s1834_s27  ;;  %1618 = vmatprep.mubr.msk.f32.mxu0 %vm1833_vm1, %v1832_v2  ;;  %s277_s27 = scalar_lea.vmem [#allocation2], %s1520_s17 }
 0x150   : > { %v622_v15 = vpop.permute.xlu0 %621 }
 0x151   : > { %1617 = vmatpush3.xpose.msk.msra.mxu0 %vm454_vm2, %v622_v15 }
 0x152   : > { %1626 = vmatprep.subr.mxu0 %v1832_v2 }
 0x154   : > { %v620_v16 = vpop.permute.xlu0 %619 }
 0x155   : > { %1619 = vmatmul.mubr.msk.f32.vlgmr.msra.gmra.mxu0 %vm454_vm2, %v620_v16 }
 0x156   : > { %1630 = vmatprep.mubr.msk.f32.mxu0 %vm1833_vm1, %v1832_v2  ;;  %1627 = vmatpush3.msra.mxu0 %v449_v37 }
 0x157   : > { %1628 = vmatprep.subr.mxu0 %v1832_v2 }
 0x158   : > { %1629 = vmatpush3.msra.mxu0 %v448_v38 }
 0x159   : > { %1640 = vmatprep.subr.mxu0 %v1832_v2 }
 0x1a1   : > { %v527_v17 = vpop.f32.mrf.mxu0 }
 0x1a2   : > { %v532_v18 = vsel %vm531_vm3, %v527_v17, -inf }
 0x1a3   : > { %533 = vmax.xlane.f32.xlu1 %v532_v18  ;;  %v1610_v19 = vpop.f32.mrf.mxu0 }
 0x1a4   : > { %v453_v19 = vld [vmem:[%s2129_s4 + $0x38] sm:$0xff] }
 0x215   : > { %v693_v20 = vpop.f32.mrf.mxu0 }
 0x216   : > { %v697_v21 = vsel %vm531_vm3, %v693_v20, -inf }
 0x217   : > { %698 = vmax.xlane.f32.xlu1 %v697_v21  ;;  %v1620_v22 = vpop.f32.mrf.mxu0 }
 0x228   : > { %543 = vrot.lane.b32.xlu1 %v1984_v11, %s1835_s28  ;;  %s1432_s28 = sshll.u32 %s277_s27, 4  ;;  %s1433_s28 = int_to_ptr.vmem [resolvable:$true] %s1432_s28 }
 0x229   : > { %s1754_s13 = scalar_lea.vmem %s1433_s28, 128 }
 0x22a   : > { %p1755_p12 = scmp.ne.s32.totalorder %s1433_s28, %s1754_s13 }
 0x22c   : > { %v534_v23 = vpop.xlane.xlu1 %533  ;;  %p1756_p13 = pnand %p1755_p12, %p1917_p4 }
 0x22d   : > { %v535_v24 = vsub.f32 %v527_v17, %v534_v23 }
 0x22e   : > { %p1757_p0 = pneg %p1756_p13 }
 0x22f   : > { %v536_v25 = vmul.f32 1.442695, %v535_v24 }
 0x231   : > { %1738 = vpow2.f32 %v536_v25 }
 0x23e   : > { %v1739_v26 = vpop.eup %1738 }
 0x23f   : > { %v538_v27 = vsel %vm531_vm3, %v1739_v26, 0.0 }
 0x240   : > { %539 = vadd.xlane.f32.xlu0 %v538_v27 }
 0x2a0   : > { %v699_v28 = vpop.xlane.xlu1 %698 }
 0x2a1   : > { %v700_v29 = vsub.f32 %v693_v20, %v699_v28  ;;  %v452_v20 = vld [vmem:[%s2129_s4 + $0x30] sm:$0xff] }
 0x2a3   : > { %v701_v30 = vmul.f32 1.442695, %v700_v29 }
 0x2a4   : > { %v544_v31 = vpop.permute.xlu1 %543 }
 0x2a5   : > { %1740 = vpow2.f32 %v701_v30  ;;  %1612 = vmatpush3.msra.mxu1 %v544_v31  ;;  %v1541_v30 = vld [vmem:[%s2130_s5] ss:$0 sm:$0xff] }
 0x2a6   : > { %1621 = vmatprep.subr.mxu1 %v1832_v2 }
 0x2b2   : > { %v1741_v32 = vpop.eup %1740 }
 0x2b3   : > { %v703_v33 = vsel %vm531_vm3, %v1741_v32, 0.0 }
 0x2b4   : > { %704 = vadd.xlane.f32.xlu1 %v703_v33 }
 0x2c5   : > { %708 = vrot.lane.b32.xlu1 %v1984_v11, %s1836_s30 }
 0x2c9   : > { %v540_v34 = vpop.xlane.xlu0 %539  ;;  %932 = vrot.lane.b32.xlu1 %v1984_v11, %s1837_s8 }
 0x2ca   : > { %1742 = vrcp.f32 %v540_v34 }
 0x2cd   : > { %930 = vrot.lane.b32.xlu1 %v1989_v12, %s1837_s8 }
 0x2d7   : > { %v1743_v35 = vpop.eup %1742 }
 0x2d8   : > { %v542_v36 = vmul.f32 %v1743_v35, %v1739_v26 }
 0x2da   : > { %1614 = vmatmul.mubr.msk.f32.vlgmr.msra.gmra.mxu1 %vm531_vm3, %v542_v36 }
 0x2db   : > { %1623 = vmatprep.mubr.msk.f32.mxu1 %vm1833_vm1, %v1832_v2 }
 0x33d   : > { %v705_v39 = vpop.xlane.xlu1 %704 }
 0x33e   : > { %1744 = vrcp.f32 %v705_v39 }
 0x341   : > { %v709_v40 = vpop.permute.xlu1 %708 }
 0x342   : > { %1622 = vmatpush3.msra.mxu1 %v709_v40 }
 0x343   : > { %1633 = vmatprep.subr.mxu1 %v1832_v2 }
 0x345   : > { %v933_v47 = vpop.permute.xlu1 %932 }
 0x349   : > { %v931_v50 = vpop.permute.xlu1 %930 }
 0x34b   : > { %v1745_v41 = vpop.eup %1744 }
 0x34c   : > { %v707_v42 = vmul.f32 %v1745_v41, %v1741_v32 }
 0x34e   : > { %1624 = vmatmul.mubr.msk.f32.vlgmr.msra.gmra.mxu1 %vm531_vm3, %v707_v42 }
 0x34f   : > { %1634 = vmatpush3.msra.mxu1 %v447_v43  ;;  %1637 = vmatprep.mubr.msk.f32.mxu1 %vm1833_vm1, %v1832_v2 }
 0x350   : > { %1635 = vmatprep.subr.mxu1 %v1832_v2 }
 0x351   : > { %1636 = vmatpush3.msra.mxu1 %v446_v44 }
 0x352   : > { %1645 = vmatprep.subr.mxu1 %v1832_v2 }
 0x39a   : > { %v615_v45 = vpop.f32.mrf.mxu1 }
 0x39b   : > { %1638 = vmatmul.mubr.msk.f32.vlgmr.msra.gmra.mxu1 %vm454_vm2, %v615_v45 }
 0x39c   : > { %v1615_v46 = vpop.f32.mrf.mxu1  ;;  %1647 = vmatprep.mubr.msk.f32.mxu1 %vm1833_vm1, %v1832_v2 }
 0x40e   : > { %v780_v48 = vpop.f32.mrf.mxu1 }
 0x40f   : > { %1631 = vmatmul.mubr.msk.f32.vlgmr.msra.gmra.mxu0 %vm454_vm2, %v780_v48 }
 0x410   : > { %1641 = vmatpush3.xpose.msk.msra.mxu0 %vm454_vm2, %v933_v47  ;;  %v1625_v49 = vpop.f32.mrf.mxu1  ;;  %1642 = vmatprep.mubr.msk.f32.mxu0 %vm1833_vm1, %v1832_v2 }
 0x411   : > { %1650 = vmatprep.subr.mxu0 %v1832_v2 }
 0x413   : > { %1643 = vmatmul.mubr.msk.f32.vlgmr.msra.gmra.mxu0 %vm454_vm2, %v931_v50 }
 0x414   : > { %1654 = vmatprep.mubr.msk.f32.mxu0 %vm1833_vm1, %v1832_v2  ;;  %1651 = vmatpush3.msra.mxu0 %v451_v0 }
 0x415   : > { %1652 = vmatprep.subr.mxu0 %v1832_v2 }
 0x416   : > { %1653 = vmatpush3.msra.mxu0 %v450_v7 }
 0x417   : > { %1662 = vmatprep.subr.mxu0 %v1832_v2 }
 0x45b   : > { %v926_v51 = vpop.f32.mrf.mxu1 }
 0x45d   : > { %v1639_v52 = vpop.f32.mrf.mxu1 }
 0x4cf   : > { %v853_v53 = vpop.f32.mrf.mxu0 }
 0x4d0   : > { %v927_v21 = vadd.f32 %v926_v51, %v853_v53 }
 0x4d1   : > { %v1632_v54 = vpop.f32.mrf.mxu0 }
 0x4d3   : > { %v1004_v55 = vpop.f32.mrf.mxu0 }
 0x4d4   : > { %v1008_v56 = vsel %vm531_vm3, %v1004_v55, -inf }
 0x4d5   : > { %1009 = vmax.xlane.f32.xlu0 %v1008_v56  ;;  %v1644_v57 = vpop.f32.mrf.mxu0 }
 0x4eb   : > { %1019 = vrot.lane.b32.xlu0 %v1984_v11, %s1838_s19 }
 0x4ef   : > { %1171 = vrot.lane.b32.xlu0 %v1984_v11, %s1839_s20 }
 0x4f3   : > { %1169 = vrot.lane.b32.xlu0 %v1989_v12, %s1839_s20  ;;  %s1543_s20 = sshll.u32 %s1822_s24, 7  ;;  %s1758_s24 = sshll.u32 %s1841_s14, 4  ;;  %s1759_s24 = int_to_ptr.vmem [resolvable:$false] %s1758_s24 }
 0x4f4   : > { %s1760_s15 = scalar_lea.vmem %s1759_s24, 256  ;;  %p1761_p1 = scmp.lt.s32.totalorder %s1433_s28, %s1759_s24 }
 0x4f5   : > { %p1762_p2 = scmp.lt.s32.totalorder %s1760_s15, %s1754_s13 }
 0x4f7   : > { %p1763_p3 = por %p1762_p2, %p1761_p1 }
 0x4f9   : > { %p1764_p5 = pnand %p1763_p3, %p1757_p0 }
 0x55e   : > { %v1010_v58 = vpop.xlane.xlu0 %1009 }
 0x55f   : > { %v1011_v59 = vsub.f32 %v1004_v55, %v1010_v58 }
 0x561   : > { %v1012_v60 = vmul.f32 1.442695, %v1011_v59 }
 0x562   : > { %v1020_v61 = vpop.permute.xlu0 %1019 }
 0x563   : > { %1746 = vpow2.f32 %v1012_v60  ;;  %1646 = vmatpush3.msra.mxu1 %v1020_v61 }
 0x564   : > { %1657 = vmatprep.subr.mxu1 %v1832_v2 }
 0x566   : > { %v1172_v4 = vpop.permute.xlu0 %1171 }
 0x56a   : > { %v1170_v6 = vpop.permute.xlu0 %1169 }
 0x570   : > { %v1747_v62 = vpop.eup %1746 }
 0x571   : > { %v1014_v63 = vsel %vm531_vm3, %v1747_v62, 0.0 }
 0x572   : > { %1015 = vadd.xlane.f32.xlu1 %v1014_v63 }
 0x5fb   : > { %v1016_v1 = vpop.xlane.xlu1 %1015 }
 0x5fc   : > { %1748 = vrcp.f32 %v1016_v1 }
 0x609   : > { %v1749_v3 = vpop.eup %1748 }
 0x60a   : > { %v1018_v5 = vmul.f32 %v1749_v3, %v1747_v62 }
 0x60c   : > { %1648 = vmatmul.mubr.msk.f32.vlgmr.msra.gmra.mxu1 %vm531_vm3, %v1018_v5 }
 0x60d   : > { %1658 = vmatpush3.xpose.msk.msra.mxu1 %vm454_vm2, %v1172_v4  ;;  %1659 = vmatprep.mubr.msk.f32.mxu1 %vm1833_vm1, %v1832_v2 }
 0x60e   : > { %1667 = vmatprep.subr.mxu1 %v1832_v2 }
 0x610   : > { %1660 = vmatmul.mubr.msk.f32.vlgmr.msra.gmra.mxu1 %vm454_vm2, %v1170_v6 }
 0x611   : > { %1671 = vmatprep.mubr.msk.f32.mxu1 %vm1833_vm1, %v1832_v2  ;;  %1668 = vmatpush3.msra.mxu1 %v453_v19 }
 0x612   : > { %1669 = vmatprep.subr.mxu1 %v1832_v2 }
 0x613   : > { %1670 = vmatpush3.msra.mxu1 %v452_v20 }
 0x6cc   : > { %v1091_v8 = vpop.f32.mrf.mxu1 }
 0x6cd   : > { %1655 = vmatmul.mubr.msk.f32.vlgmr.msra.gmra.mxu0 %vm454_vm2, %v1091_v8 }
 0x6ce   : > { %v1649_v9 = vpop.f32.mrf.mxu1  ;;  %1664 = vmatprep.mubr.msk.f32.mxu0 %vm1833_vm1, %v1832_v2 }
 0x6d0   : > { %v1243_v10 = vpop.f32.mrf.mxu1 }
 0x6d1   : > { %v1247_v12 = vsel %vm531_vm3, %v1243_v10, -inf }
 0x6d2   : > { %1248 = vmax.xlane.f32.xlu0 %v1247_v12  ;;  %v1661_v13 = vpop.f32.mrf.mxu1 }
 0x75b   : > { %v1249_v14 = vpop.xlane.xlu0 %1248 }
 0x75c   : > { %v1250_v15 = vsub.f32 %v1243_v10, %v1249_v14 }
 0x75e   : > { %v1251_v16 = vmul.f32 1.442695, %v1250_v15 }
 0x760   : > { %1750 = vpow2.f32 %v1251_v16 }
 0x76d   : > { %v1751_v17 = vpop.eup %1750 }
 0x76e   : > { %v1253_v18 = vsel %vm531_vm3, %v1751_v17, 0.0 }
 0x76f   : > { %1254 = vadd.xlane.f32.xlu1 %v1253_v18 }
 0x780   : > { %1258 = vrot.lane.b32.xlu1 %v1984_v11, %s1840_s11  ;;  %s1430_s11 = scalar_lea.hbm %s2131_s6, %s1543_s20 }
 0x78d   : > { %v1164_v22 = vpop.f32.mrf.mxu0 }
 0x78e   : > { %v1168_v23 = vadd.f32 %v1164_v22, %v927_v21 }
 0x78f   : > { %v1656_v24 = vpop.f32.mrf.mxu0 }
 0x7f8   : > { %v1255_v25 = vpop.xlane.xlu1 %1254 }
 0x7f9   : > { %1752 = vrcp.f32 %v1255_v25 }
 0x7fc   : > { %v1259_v11 = vpop.permute.xlu1 %1258 }
 0x7fd   : > { %1663 = vmatpush3.msra.mxu0 %v1259_v11 }
 0x806   : > { %v1753_v26 = vpop.eup %1752 }
 0x807   : > { %v1257_v27 = vmul.f32 %v1753_v26, %v1751_v17 }
 0x809   : > { %1665 = vmatmul.mubr.msk.f32.vlgmr.msra.gmra.mxu0 %vm531_vm3, %v1257_v27 }
 0x8c9   : > { %v1330_v28 = vpop.f32.mrf.mxu0 }
 0x8ca   : > { %1672 = vmatmul.mubr.msk.f32.vlgmr.msra.gmra.mxu1 %vm454_vm2, %v1330_v28 }
 0x8cb   : > { %v1666_v29 = vpop.f32.mrf.mxu0 }
 0x98a   : > { %v1403_v2 = vpop.f32.mrf.mxu1 }
 0x98b   : > { %v1407_v31 = vadd.f32 %v1403_v2, %v1168_v23 }
 0x98c   : > { %v1673_v32 = vpop.f32.mrf.mxu1 }
 0x98d   : > { %v1415_v33 = vadd.f32 %v1541_v30, %v1407_v31 }
 0x98f   : > { %1416 = vst.msk [vmem:[%s277_s27] sm:$0xff] %vm295_vm0, %v1415_v33 }
 0x990   : > { %1767 = shalt.err (!%p1764_p5)
}
 0x991   : > { %s1768_s17 = scalar_lea.hbm %s1430_s11, 128  ;;  %s1772_s19 = scalar_lea.hbm %s2131_s6, 256 }
 0x992   : > { %p1769_p6 = scmp.ne.s32.totalorder %s1430_s11, %s1768_s17  ;;  %p1773_p10 = scmp.lt.s32.totalorder %s1430_s11, %s2131_s6 }
 0x993   : > { %p1774_p11 = scmp.lt.s32.totalorder %s1772_s19, %s1768_s17 }
 0x994   : > { %p1770_p7 = pnand %p1769_p6, %p1917_p4 }
 0x995   : > { %p1775_p12 = por %p1774_p11, %p1773_p10 }
 0x996   : > { %p1771_p9 = pneg %p1770_p7 }
 0x998   : > { %p1776_p13 = pnand %p1775_p12, %p1771_p9 }
 0x99a   : > { %1779 = shalt.err (!%p1776_p13)
}
 0x99b   : > { %1674 = dma.vmem_to_hbm [thread:$0]  (%p1917_p4), %s1433_s28, 128, %s1430_s11, %s1418_s12  }
 0x99c PF: > { %p1680_p0 = scmp.ge.s32.totalorder %s1830_s26, 2  ;;  %s1444_s30 = sand.u32 1, %s1810_s21  }
 0x99d   : > { %s1445_s8 = scalar_lea.sflag [#allocation3], %s1444_s30 }
 0x99e   : > { %p1677_p1 = pnand %p1680_p0, %p1924_p8 }
 0x9a0   : > { %p1678_p2 = pneg %p1677_p1 }
 0x9a2   : > { %1805 = dma.done.wait (%p1678_p2), %s1445_s8, 128  }
 0x9a3   : > { %1807 = vsyncadd (%p1678_p2), %s1445_s8, 4294967168  ;;  %s19_s26 = sadd.s32 1, %s1830_s26   ;;  %s2134_s21 = smov %s1814_s22 }
 0x9a4   : > { %p16_p3 = scmp.ge.s32.totalorder %s19_s26, 4   ;;  %s2135_s22 = smov %s1818_s23 }
 0x9a5   : > { %s2136_s23 = smov %s1930_s10  ;;  %s2137_s24 = smov %s1826_s25 }
 0x9a6   : > { %s2138_s25 = smov %s2140_s29  ;;  %18 = sbr.rel (!%p16_p3) target bundleno = 4 (0x4), region = 82 }
 0x9ab   :  { %1450 = vsyncpa [#allocation3], 1 }
 0x9ac   :  { %1452 = vsyncpa [#allocation3 + $0x1], 1 }

</bundles_post_ra>
